<compile_context>
chip_gen: v7x
topology: tpu7x:2x2x1
jax: 0.10.0
libtpu: 0.0.40
codegen_flags: <defaults>
</compile_context>

<pallas_src>
import jax
import jax.numpy as jnp
from jax.experimental import pallas as pl
from jax.experimental.pallas import tpu as pltpu


# Per-grid-step sizing constants (bytes).
_TARGET_STEP_BYTES = 4 * 1024 * 1024     # ~HBM traffic per step to beat 0.35us overhead
_MIN_STEP_BYTES = 1 * 1024 * 1024        # never split steps below this much traffic
_VMEM_BLOCK_BUDGET = 16 * 1024 * 1024    # double-buffered (sublane-padded) in+out blocks
_VMEM_LIMIT_BYTES = 32 * 1024 * 1024     # explicit scoped-VMEM limit (safe on v5e/v6e/v7x)
_MIN_STEPS = 8                           # ~4 steps per TensorCore on dual-TC chips
_MAX_BATCH_FOLD = 64                     # bound the static unroll inside the kernel


def _outconv_kernel(w_ref, b_ref, x_ref, o_ref):
    # w_ref: (C_out, C_in)    f32 weight (same block every grid step)
    # b_ref: (C_out, 1)       f32 bias column, broadcast along lanes
    # x_ref: (Bn, C_in, TILE) input pixels, pixels on the lane axis
    # o_ref: (Bn, C_out, TILE) lane-dense output block
    w = w_ref[...]
    b = b_ref[...]
    for bi in range(x_ref.shape[0]):        # Bn is small & static -> unrolled
        acc = jnp.dot(w, x_ref[bi], preferred_element_type=jnp.float32)
        o_ref[bi] = (acc + b).astype(o_ref.dtype)


def _sublane_tile(itemsize):
    # f32 -> 8 sublanes, bf16 -> 16, int8 -> 32 (packed dtypes pad deeper).
    return 8 * max(1, 4 // itemsize)


def _choose_tiling(N, HW, C_in, C_out, in_dtype, out_dtype):
    """Pick (Bn, TILE, grid_j): ~_TARGET_STEP_BYTES of HBM traffic per step,
    double-buffered blocks within _VMEM_BLOCK_BUDGET, and enough grid steps
    for dual-TensorCore sharding + pipelining when the total work allows."""
    in_item = jnp.dtype(in_dtype).itemsize
    out_item = jnp.dtype(out_dtype).itemsize

    def pad(c, item):
        t = _sublane_tile(item)
        return ((c + t - 1) // t) * t

    traffic_per_pix = C_in * in_item + C_out * out_item
    vmem_per_pix = 2 * (pad(C_in, in_item) * in_item +
                        pad(C_out, out_item) * out_item)

    cap = min(_TARGET_STEP_BYTES // traffic_per_pix,
              _VMEM_BLOCK_BUDGET // vmem_per_pix)
    cap = max(cap, 128)

    # Keep >= _MIN_STEPS steps when there is enough total work, but never
    # shrink a step below ~_MIN_STEP_BYTES of traffic.
    total_pix = N * HW
    min_pix = max(128, _MIN_STEP_BYTES // traffic_per_pix)
    if total_pix >= _MIN_STEPS * min_pix:
        cap = min(cap, max(min_pix, total_pix // _MIN_STEPS))

    if HW <= cap:
        # Whole image per step (full-extent block, exempt from the 128 rule);
        # fold batch elements to fill the step.
        tile = HW
        grid_j = 1
        bn = 1
        max_bn = min(N, _MAX_BATCH_FOLD, max(1, cap // HW))
        for d in range(max_bn, 0, -1):
            if N % d == 0:
                bn = d
                break
    else:
        bn = 1
        tile = max(128, (cap // 128) * 128)
        # Prefer a multiple-of-128 tile that divides HW exactly (no ragged
        # tail); otherwise keep the cap-sized tile and let the cdiv grid
        # handle the ragged last block -- never jnp.pad.
        t = tile
        while t >= max(128, tile // 2):
            if HW % t == 0:
                tile = t
                break
            t -= 128
        grid_j = pl.cdiv(HW, tile)
    return bn, tile, grid_j


@jax.jit
def outconv_forward(x_nchw, weight, bias):
    """1x1 Conv2d forward (NCHW in, NCHW out).

    x_nchw: (N, C_in, H, W)
    weight: (C_out, C_in) or (C_out, C_in, 1, 1)   -- nn.Conv2d weight
    bias:   (C_out,)
    """
    N, C_in, H, W = x_nchw.shape
    C_out = weight.shape[0]
    HW = H * W
    out_dtype = x_nchw.dtype

    # NCHW is already (C_in, pixels) per batch element -- free reshape.
    x3d = x_nchw.reshape(N, C_in, HW)
    # Keep weights/bias in f32 (matches PyTorch f32-weight conv; negligible
    # extra traffic at (C_out, C_in)).
    w2d = weight.reshape(C_out, C_in).astype(jnp.float32)
    bcol = bias.reshape(C_out, 1).astype(jnp.float32)

    bn, tile, grid_j = _choose_tiling(N, HW, C_in, C_out, x_nchw.dtype, out_dtype)
    grid = (N // bn, grid_j)

    in_item = jnp.dtype(x_nchw.dtype).itemsize
    out_item = jnp.dtype(out_dtype).itemsize
    cost = pl.CostEstimate(
        flops=2 * N * HW * C_in * C_out,
        transcendentals=0,
        bytes_accessed=(N * HW * (C_in * in_item + C_out * out_item)
                        + C_out * C_in * 4 + C_out * 4),
    )

    out3d = pl.pallas_call(
        _outconv_kernel,
        out_shape=jax.ShapeDtypeStruct((N, C_out, HW), out_dtype),
        grid_spec=pltpu.PrefetchScalarGridSpec(
            num_scalar_prefetch=0,
            grid=grid,
            in_specs=[
                pl.BlockSpec((C_out, C_in), lambda i, j: (0, 0)),
                pl.BlockSpec((C_out, 1), lambda i, j: (0, 0)),
                pl.BlockSpec((bn, C_in, tile), lambda i, j: (i, 0, j)),
            ],
            out_specs=pl.BlockSpec((bn, C_out, tile), lambda i, j: (i, 0, j)),
        ),
        compiler_params=pltpu.CompilerParams(
            dimension_semantics=("parallel", "parallel"),
            vmem_limit_bytes=_VMEM_LIMIT_BYTES,
        ),
        cost_estimate=cost,
    )(w2d, bcol, x3d)

    return out3d.reshape(N, C_out, H, W)


if __name__ == "__main__":
    # Deterministic synthetic parameters (shapes from nn.Conv2d(in_ch, out_ch, 1)).
    in_ch, out_ch = 4, 3
    N, H, W = 2, 16, 16

    key = jax.random.PRNGKey(0)
    kx, kw, kb = jax.random.split(key, 3)

    x = jax.random.normal(kx, (N, in_ch, H, W), dtype=jnp.float32)
    # nn.Conv2d weight shape is (out_ch, in_ch, 1, 1); we keep it squeezed.
    weight = jax.random.normal(kw, (out_ch, in_ch), dtype=jnp.float32) * 0.1
    bias = jax.random.normal(kb, (out_ch,), dtype=jnp.float32) * 0.1

    y = outconv_forward(x, weight, bias)
    y = jax.block_until_ready(y)

    # Reference check (plain JAX einsum, same semantics as F.conv2d with k=1).
    y_ref = jnp.einsum("nchw,oc->nohw", x, weight) + bias[None, :, None, None]
    assert y.shape == (N, out_ch, H, W)
    assert jnp.allclose(y, y_ref, atol=1e-5, rtol=1e-5)

    print("KERNEL_OK")
</pallas_src>

<mosaic_0001>
module attributes {stable_mosaic.version = 11 : i64} {
  func.func @_outconv_kernel(%arg0: i32, %arg1: i32, %arg2: memref<3x4xf32, #tpu.memory_space<vmem>>, %arg3: memref<3x1xf32, #tpu.memory_space<vmem>>, %arg4: memref<2x4x256xf32, #tpu.memory_space<vmem>>, %arg5: memref<2x3x256xf32, #tpu.memory_space<vmem>>) attributes {dimension_semantics = [#tpu.dimension_semantics<parallel>, #tpu.dimension_semantics<parallel>], iteration_bounds = array<i64: 1, 1>, scalar_prefetch = 0 : i64, scratch_operands = 0 : i64, tpu.core_type = #tpu.core_type<tc>, window_params = [{pipeline_mode = #tpu.pipeline_mode<synchronous>, transform_indices = @transform_0, window_bounds = array<i64: 3, 4>}, {pipeline_mode = #tpu.pipeline_mode<synchronous>, transform_indices = @transform_1, window_bounds = array<i64: 3, 1>}, {transform_indices = @transform_2, window_bounds = array<i64: 2, 4, 256>}, {transform_indices = @transform_3, window_bounds = array<i64: 2, 3, 256>}]} {
    %c0 = arith.constant 0 : index
    %c0_0 = arith.constant 0 : index
    %0 = vector.load %arg2[%c0, %c0_0] : memref<3x4xf32, #tpu.memory_space<vmem>>, vector<3x4xf32>
    %c0_1 = arith.constant 0 : index
    %c0_2 = arith.constant 0 : index
    %1 = vector.load %arg3[%c0_1, %c0_2] : memref<3x1xf32, #tpu.memory_space<vmem>>, vector<3x1xf32>
    %c0_3 = arith.constant 0 : index
    %c0_4 = arith.constant 0 : index
    %c0_5 = arith.constant 0 : index
    %2 = vector.load %arg4[%c0_3, %c0_4, %c0_5] : memref<2x4x256xf32, #tpu.memory_space<vmem>>, vector<1x4x256xf32>
    %3 = vector.shape_cast %2 : vector<1x4x256xf32> to vector<4x256xf32>
    %cst = arith.constant dense<0.000000e+00> : vector<3x256xf32>
    %4 = tpu.matmul %0, %3, %cst {dimension_numbers = #tpu.dot_dimension_numbers<[1], [0], [0], [1], [0, 0, 1, 1], [], []>} : vector<3x4xf32>, vector<4x256xf32>, vector<3x256xf32> -> vector<3x256xf32>
    %5 = vector.broadcast %1 : vector<3x1xf32> to vector<3x256xf32>
    %6 = arith.addf %4, %5 : vector<3x256xf32>
    %c0_6 = arith.constant 0 : index
    %c0_7 = arith.constant 0 : index
    %c0_8 = arith.constant 0 : index
    %7 = vector.load %arg5[%c0_6, %c0_7, %c0_8] : memref<2x3x256xf32, #tpu.memory_space<vmem>>, vector<1x3x256xf32>
    %8 = vector.shape_cast %7 : vector<1x3x256xf32> to vector<3x256xf32>
    %9 = vector.shape_cast %6 : vector<3x256xf32> to vector<1x3x256xf32>
    tpu.vector_store %arg5[%c0_6, %c0_7, %c0_8], %9 {strides = array<i32>} : memref<2x3x256xf32, #tpu.memory_space<vmem>>, vector<1x3x256xf32>,
    %c1 = arith.constant 1 : index
    %c0_9 = arith.constant 0 : index
    %c0_10 = arith.constant 0 : index
    %10 = vector.load %arg4[%c1, %c0_9, %c0_10] : memref<2x4x256xf32, #tpu.memory_space<vmem>>, vector<1x4x256xf32>
    %11 = vector.shape_cast %10 : vector<1x4x256xf32> to vector<4x256xf32>
    %cst_11 = arith.constant dense<0.000000e+00> : vector<3x256xf32>
    %12 = tpu.matmul %0, %11, %cst_11 {dimension_numbers = #tpu.dot_dimension_numbers<[1], [0], [0], [1], [0, 0, 1, 1], [], []>} : vector<3x4xf32>, vector<4x256xf32>, vector<3x256xf32> -> vector<3x256xf32>
    %13 = vector.broadcast %1 : vector<3x1xf32> to vector<3x256xf32>
    %14 = arith.addf %12, %13 : vector<3x256xf32>
    %c1_12 = arith.constant 1 : index
    %c0_13 = arith.constant 0 : index
    %c0_14 = arith.constant 0 : index
    %15 = vector.load %arg5[%c1_12, %c0_13, %c0_14] : memref<2x3x256xf32, #tpu.memory_space<vmem>>, vector<1x3x256xf32>
    %16 = vector.shape_cast %15 : vector<1x3x256xf32> to vector<3x256xf32>
    %17 = vector.shape_cast %14 : vector<3x256xf32> to vector<1x3x256xf32>
    tpu.vector_store %arg5[%c1_12, %c0_13, %c0_14], %17 {strides = array<i32>} : memref<2x3x256xf32, #tpu.memory_space<vmem>>, vector<1x3x256xf32>,
    return
  }
  func.func @transform_0(%arg0: i32, %arg1: i32) -> (i32, i32) {
    %c0_i32 = arith.constant 0 : i32
    %c0_i32_0 = arith.constant 0 : i32
    %c0_i32_1 = arith.constant 0 : i32
    return %c0_i32, %c0_i32_0 : i32, i32
  }
  func.func @transform_1(%arg0: i32, %arg1: i32) -> (i32, i32) {
    %c0_i32 = arith.constant 0 : i32
    %c0_i32_0 = arith.constant 0 : i32
    %c0_i32_1 = arith.constant 0 : i32
    return %c0_i32, %c0_i32_0 : i32, i32
  }
  func.func @transform_2(%arg0: i32, %arg1: i32) -> (i32, i32, i32) {
    %c0_i32 = arith.constant 0 : i32
    %c0_i32_0 = arith.constant 0 : i32
    return %arg0, %c0_i32, %arg1 : i32, i32, i32
  }
  func.func @transform_3(%arg0: i32, %arg1: i32) -> (i32, i32, i32) {
    %c0_i32 = arith.constant 0 : i32
    %c0_i32_0 = arith.constant 0 : i32
    return %arg0, %c0_i32, %arg1 : i32, i32, i32
  }
}

</mosaic_0001>

<bundles_post_ra>
// kernel: outconv_forward.1
= control target key start
LH: loop header
LB: loop body
LE: loop exit
PB: predicated region body
PF: predicated region fallthrough
CT: control target
= control target key end

     0   :  { %vm28_vm0 = vcmask 1043456   ;;  %v211_v2 = vmov 0.0   ;;  %v212_v5 = vmov 0   ;;  %vm24_vm1 = vcmask 31744   ;;  %s255_s2 = inlined_call_operand.vmem [shape: f32[2,4,256], index: 2, kind: input, shape index: {}]   ;;  %s256_s0 = inlined_call_operand.vmem [shape: f32[3,4], index: 0, kind: input, shape index: {}]   ;;  %s257_s1 = inlined_call_operand.vmem [shape: f32[3,1], index: 1, kind: input, shape index: {}]   ;;  %s258_s3 = inlined_call_operand.vmem [shape: f32[2,3,256], index: 3, kind: output, shape index: {}]  }
   0x1   :  { %v16_v0 = vld [vmem:[%s255_s2] sm:$0xff]  ;;  %v201_v1 = vld [vmem:[%s255_s2 + $0x8] sm:$0xff]  ;;  %97 = vmatprep.mubr.f32.mxu0 %v211_v2  ;;  %181 = vmatprep.mubr.f32.mxu1 %v211_v2 }
   0x2   :  { %v23_v3 = vcombine.high %v16_v0, %v16_v0  ;;  %v112_v4 = vcombine.high %v201_v1, %v201_v1  ;;  %208 = vset.pattern.permute.xlu0 %v212_v5  ;;  %v15_v6 = vld [vmem:[%s257_s1] sm:$0x7] }
   0x3   :  { %v14_v7 = vld [vmem:[%s256_s0] sm:$0x7]  ;;  %19 = vperm.xlu0 %208, %v15_v6  }
   0x4   :  { %198 = vmatprep.subr.msk.mxu0 %vm28_vm0, %v23_v3  ;;  %202 = vmatprep.subr.msk.mxu1 %vm28_vm0, %v112_v4 }
   0x5   :  { %199 = vmatpush1.msk.msra.mxu0 %vm28_vm0, %v16_v0  ;;  %203 = vmatpush1.msk.msra.mxu1 %vm28_vm0, %v201_v1 }
   0x6   :  { %200 = vmatmul.mubr.msk.f32.vlgmr.msra.gmra.mrb[0].mxu0 %vm24_vm1, %v14_v7  ;;  %204 = vmatmul.mubr.msk.f32.vlgmr.msra.gmra.mrb[0].mxu1 %vm24_vm1, %v14_v7 }
  0x82   :  { %v20_v8 = vpop.permute.xlu0 %19 }
  0xd9   :  { %v99_v9 = vpop.f32.mrb[0].mxu0  ;;  %v183_v10 = vpop.f32.mrb[0].mxu1 }
  0xda   :  { %v100_v11 = vadd.f32 %v99_v9, %v20_v8  ;;  %v184_v12 = vadd.f32 %v183_v10, %v20_v8  ;;  %v101_v13 = vpop.f32.mrb[1].mxu0  ;;  %v185_v14 = vpop.f32.mrb[1].mxu1 }
  0xdb   :  { %v102_v15 = vadd.f32 %v101_v13, %v20_v8  ;;  %v186_v16 = vadd.f32 %v185_v14, %v20_v8 }
  0xdd   :  { %v106_v17 = vcombine.low %v100_v11, %v102_v15  ;;  %v190_v18 = vcombine.low %v184_v12, %v186_v16 }
  0xdf   :  { %108 = vst [vmem:[%s258_s3] sm:$0x77] %v106_v17  ;;  %205 = vst [vmem:[%s258_s3 + $0x8] sm:$0x77] %v190_v18 }

</bundles_post_ra>
